<compile_context>
chip_gen: v7x
topology: tpu7x:2x2x1
jax: 0.10.0
libtpu: 0.0.40
codegen_flags: <defaults>
</compile_context>

<pallas_src>
import functools

import jax
import jax.numpy as jnp
import numpy as np
from jax.experimental import pallas as pl
from jax.experimental.pallas import tpu as pltpu


def _vq_kernel(z_ref, eaug_ref, et_ref, zq_ref, idx_ref, hist_ref, sqerr_ref, *,
               fold_ones):
    z = z_ref[0]                     # (D, THW)   channel-major tile (D sublanes, HW lanes)
    e_aug = eaug_ref[...]            # (n_e, D+1) = [-2*E | ||E||^2]  (resident)
    e_t = et_ref[...]                # (D, n_e)   codebook transposed (resident)
    n_e = e_aug.shape[0]
    D, THW = z.shape

    # d[i, p] = ||e_i||^2 - 2 e_i . z_p .  The ||z_p||^2 term of the reference
    # formula is a per-column constant and is dropped (argmin-invariant).
    if fold_ones:
        # Single augmented matmul: the MXU applies the ||e||^2 broadcast for free.
        z_aug = jnp.concatenate([z, jnp.ones((1, THW), jnp.float32)], axis=0)  # (D+1, THW)
        d = jax.lax.dot_general(e_aug, z_aug, (((1,), (0,)), ((), ())),
                                preferred_element_type=jnp.float32)            # (n_e, THW)
    else:
        # Fallback when D is not sublane-aligned: one broadcast-add instead.
        d = jax.lax.dot_general(e_aug[:, :D], z, (((1,), (0,)), ((), ())),
                                preferred_element_type=jnp.float32)
        d = d + e_aug[:, D:D + 1]

    # argmin over the codebook (sublane) axis; first minimal index, like torch.argmin.
    d_min = jnp.min(d, axis=0, keepdims=True)                        # (1, THW)
    iota = jax.lax.broadcasted_iota(jnp.int32, d.shape, 0)           # (n_e, THW) int32
    idx = jnp.min(jnp.where(d == d_min, iota, n_e),
                  axis=0, keepdims=True)                             # (1, THW) int32

    # One-hot gather on the MXU (exact in f32): zq[:, p] = codebook[idx_p, :]^T.
    onehot = (iota == idx).astype(jnp.float32)                       # (n_e, THW)
    zq = jax.lax.dot_general(e_t, onehot, (((1,), (0,)), ((), ())),
                             preferred_element_type=jnp.float32)     # (D, THW)

    zq_ref[0] = zq.astype(zq_ref.dtype)
    idx_ref[0] = idx

    # Per-code usage counts for this tile (lane reduce -> XLU, which has slack).
    hist_ref[0] = jnp.sum(onehot, axis=1, keepdims=True)             # (n_e, 1)

    # Exact squared error, fully reduced to a single scalar per tile.
    diff = zq - z
    ssq = jnp.sum(diff * diff, axis=0, keepdims=True)                # (1, THW)
    sqerr_ref[0] = jnp.sum(ssq, axis=1, keepdims=True)               # (1, 1)


def _pick_tile_hw(HW, n_e, D, budget_bytes=16 * 1024 * 1024):
    """Largest multiple-of-128 divisor of HW whose intermediates fit the budget."""
    if HW % 128 != 0:
        # TODO(synk): pad HW up to a multiple of 128 (with masked finalization) so
        # stores stay lane-dense even for non-2^k feature maps.
        return HW
    # d / iota / onehot / masks / temps (~6*n_e f32 per lane column) plus the
    # (double-buffered) z / z_q blocks and z_aug (~6*(D+1) per lane column).
    per_lane_bytes = 4 * (6 * n_e + 6 * (D + 1))
    cap = max(128, min(8192, (budget_bytes // per_lane_bytes) // 128 * 128))
    t = cap
    while t >= 128:
        if HW % t == 0:
            return t
        t -= 128
    return 128


def _vmem_limit_bytes(n_e, D, tile_hw):
    """Conservative VMEM footprint estimate -> explicit scoped-VMEM limit."""
    f32 = 4
    io = 2 * f32 * (2 * D * tile_hw        # z in + z_q out blocks (double-buffered)
                    + 8 * tile_hw          # idx block (padded to 8 sublanes)
                    + n_e * 128            # hist block (lane-padded)
                    + 8 * 128)             # sqerr block
    resident = 2 * f32 * (n_e * 128 + max(D, 8) * max(n_e, 128))   # e_aug, e_t (padded)
    interm = f32 * (6 * n_e + 3 * (D + 8)) * tile_hw
    total = io + resident + interm
    return int(min(48 * 1024 * 1024, max(32 * 1024 * 1024, 2 * total)))


def vector_quantizer_forward(z_nchw, codebook, *, beta=0.25, legacy=True,
                             tile_hw=None):
    """Forward pass matching VectorQuantizer.forward (remap=None, use_norm=False)."""
    B, C, H, W = z_nchw.shape
    n_e, D = codebook.shape
    assert C == D, "channel dim must equal embedding_dim"

    HW = H * W
    if tile_hw is None:
        tile_hw = _pick_tile_hw(HW, n_e, D)
        # v7x has 2 TensorCores per chip: make sure the parallel grid has >= 2 steps.
        if B * (HW // tile_hw) < 2 and tile_hw % 256 == 0:
            tile_hw //= 2
    assert HW % tile_hw == 0
    assert tile_hw % 128 == 0 or tile_hw == HW
    num_t = HW // tile_hw

    # Channel-major flattening: pure reshape of NCHW, no transpose / extra HBM traffic.
    z_flat = z_nchw.reshape(B, D, HW).astype(jnp.float32)            # (B, D, HW)
    codebook = codebook.astype(jnp.float32)
    e2 = jnp.sum(codebook * codebook, axis=1, keepdims=True)         # (n_e, 1)
    e_aug = jnp.concatenate([-2.0 * codebook, e2], axis=1)           # (n_e, D+1), tiny
    e_t = codebook.T                                                 # (D, n_e), tiny

    fold_ones = (D % 8 == 0)   # sublane-aligned concat of the ones row is cheap & legal
    kernel = functools.partial(_vq_kernel, fold_ones=fold_ones)

    out_shapes = (
        jax.ShapeDtypeStruct((B, D, HW), jnp.float32),                 # z_q (channel-major)
        jax.ShapeDtypeStruct((B * num_t, 1, tile_hw), jnp.int32),      # encoding indices
        jax.ShapeDtypeStruct((B * num_t, n_e, 1), jnp.float32),        # per-tile code histogram
        jax.ShapeDtypeStruct((B * num_t, 1, 1), jnp.float32),          # per-tile sum of squared error
    )

    zq_flat, idx, hist, sqerr = pl.pallas_call(
        kernel,
        out_shape=out_shapes,
        grid_spec=pltpu.PrefetchScalarGridSpec(
            num_scalar_prefetch=0,
            grid=(B, num_t),
            in_specs=[
                pl.BlockSpec((1, D, tile_hw), lambda b, t: (b, 0, t)),
                pl.BlockSpec((n_e, D + 1), lambda b, t: (0, 0)),
                pl.BlockSpec((D, n_e), lambda b, t: (0, 0)),
            ],
            out_specs=[
                pl.BlockSpec((1, D, tile_hw), lambda b, t: (b, 0, t)),
                pl.BlockSpec((1, 1, tile_hw), lambda b, t: (b * num_t + t, 0, 0)),
                pl.BlockSpec((1, n_e, 1), lambda b, t: (b * num_t + t, 0, 0)),
                pl.BlockSpec((1, 1, 1), lambda b, t: (b * num_t + t, 0, 0)),
            ],
        ),
        compiler_params=pltpu.CompilerParams(
            dimension_semantics=("parallel", "parallel"),
            vmem_limit_bytes=_vmem_limit_bytes(n_e, D, tile_hw),
        ),
    )(z_flat, e_aug, e_t)

    # ---- cheap, dense finalization in plain JAX (no scatter-add) ----
    denom = jnp.float32(HW * D)
    ssq_per_batch = sqerr.reshape(B, num_t).sum(axis=1)                # (B,)
    commit_loss = (ssq_per_batch / denom).reshape(B, 1, 1, 1)          # mean over (h,w,c), keepdim
    emb_loss = commit_loss                                             # same forward value (detach only affects grads)

    if legacy:
        loss = emb_loss + beta * commit_loss
    else:
        loss = beta * emb_loss + commit_loss

    # Straight-through estimator: forward value of z + (z_q - z).detach() is just z_q.
    # TODO(synk): straight-through / detach gradient semantics (custom_vjp) not implemented; forward values match.
    z_q_nchw = zq_flat.reshape(B, D, H, W)                             # zero-copy back to NCHW

    encoding_indices = idx.reshape(-1)                                 # (B*H*W,) int32
    counts = hist.reshape(B * num_t, n_e).sum(axis=0)                  # dense sum of in-kernel histograms
    avg_probs = counts / jnp.float32(B * HW)
    perplexity = jnp.exp(-jnp.sum(avg_probs * jnp.log(avg_probs + 1e-10)))

    min_encodings = None
    return (z_q_nchw, loss,
            (encoding_indices, min_encodings,
             commit_loss.mean(), beta * emb_loss.mean(), perplexity))


def _reference_forward_np(z_nchw, codebook, *, beta=0.25, legacy=True):
    """NumPy float64 reference mirroring the PyTorch forward (for validation)."""
    z = np.asarray(z_nchw, dtype=np.float64)
    e = np.asarray(codebook, dtype=np.float64)
    B, C, H, W = z.shape
    zb = np.transpose(z, (0, 2, 3, 1))                  # b h w c
    zf = zb.reshape(-1, C)
    d = (np.sum(zf ** 2, axis=1, keepdims=True)
         + np.sum(e ** 2, axis=1)[None, :]
         - 2.0 * zf @ e.T)
    idx = np.argmin(d, axis=1)
    zq = e[idx].reshape(B, H, W, C)
    commit = np.mean((zq - zb) ** 2, axis=(1, 2, 3), keepdims=True)
    emb = commit
    loss = (emb + beta * commit) if legacy else (beta * emb + commit)
    onehot = np.zeros((zf.shape[0], e.shape[0]), np.float64)
    onehot[np.arange(zf.shape[0]), idx] = 1.0
    avg_probs = onehot.mean(axis=0)
    perp = np.exp(-np.sum(avg_probs * np.log(avg_probs + 1e-10)))
    return (np.transpose(zq, (0, 3, 1, 2)), loss,
            (idx.astype(np.int32), None, commit.mean(), beta * emb.mean(), perp))


if __name__ == "__main__":
    # Small shapes consistent with the module: num_embeddings=128, embedding_dim=8.
    B, C, H, W = 2, 8, 16, 16
    n_e, e_dim = 128, C

    key = jax.random.PRNGKey(0)
    k_z, k_e = jax.random.split(key)
    z = jax.random.normal(k_z, (B, C, H, W), dtype=jnp.float32)
    # nn.Embedding(n_e, e_dim).weight.data.uniform_(-1/n_e, 1/n_e)
    codebook = jax.random.uniform(k_e, (n_e, e_dim), dtype=jnp.float32,
                                  minval=-1.0 / n_e, maxval=1.0 / n_e)

    z_q_r, loss_r, (idx_r, _, commit_r, emb_r, perp_r) = _reference_forward_np(
        z, codebook, beta=0.25, legacy=True)

    # Exercise both the default (single-tile) path and an explicit 2-tile split.
    for thw in (None, 128):
        z_q, loss, (enc_idx, min_enc, commit_m, emb_m, perp) = vector_quantizer_forward(
            z, codebook, beta=0.25, legacy=True, tile_hw=thw)
        jax.block_until_ready(z_q)
        jax.block_until_ready(loss)
        jax.block_until_ready(perp)

        np.testing.assert_array_equal(np.asarray(enc_idx), idx_r)
        np.testing.assert_allclose(np.asarray(z_q), z_q_r, rtol=1e-5, atol=1e-6)
        np.testing.assert_allclose(np.asarray(loss), loss_r, rtol=1e-5, atol=1e-6)
        np.testing.assert_allclose(np.asarray(commit_m), commit_r, rtol=1e-5, atol=1e-6)
        np.testing.assert_allclose(np.asarray(emb_m), emb_r, rtol=1e-5, atol=1e-6)
        np.testing.assert_allclose(np.asarray(perp), perp_r, rtol=1e-5, atol=1e-6)

    print("KERNEL_OK")
</pallas_src>

<mosaic_0001>
module attributes {stable_mosaic.version = 11 : i64} {
  func.func @_vq_kernel(%arg0: i32, %arg1: i32, %arg2: memref<1x8x256xf32, #tpu.memory_space<vmem>>, %arg3: memref<128x9xf32, #tpu.memory_space<vmem>>, %arg4: memref<8x128xf32, #tpu.memory_space<vmem>>, %arg5: memref<1x8x256xf32, #tpu.memory_space<vmem>>, %arg6: memref<1x1x256xi32, #tpu.memory_space<vmem>>, %arg7: memref<1x128x1xf32, #tpu.memory_space<vmem>>, %arg8: memref<1x1x1xf32, #tpu.memory_space<vmem>>) attributes {dimension_semantics = [#tpu.dimension_semantics<parallel>, #tpu.dimension_semantics<parallel>], iteration_bounds = array<i64: 2, 1>, scalar_prefetch = 0 : i64, scratch_operands = 0 : i64, tpu.core_type = #tpu.core_type<tc>, window_params = [{transform_indices = @transform_0, window_bounds = array<i64: 1, 8, 256>}, {pipeline_mode = #tpu.pipeline_mode<synchronous>, transform_indices = @transform_1, window_bounds = array<i64: 128, 9>}, {pipeline_mode = #tpu.pipeline_mode<synchronous>, transform_indices = @transform_2, window_bounds = array<i64: 8, 128>}, {transform_indices = @transform_3, window_bounds = array<i64: 1, 8, 256>}, {transform_indices = @transform_4, window_bounds = array<i64: 1, 1, 256>}, {transform_indices = @transform_5, window_bounds = array<i64: 1, 128, 1>}, {transform_indices = @transform_6, window_bounds = array<i64: 1, 1, 1>}]} {
    %c0 = arith.constant 0 : index
    %c0_0 = arith.constant 0 : index
    %c0_1 = arith.constant 0 : index
    %0 = vector.load %arg2[%c0, %c0_0, %c0_1] : memref<1x8x256xf32, #tpu.memory_space<vmem>>, vector<1x8x256xf32>
    %1 = vector.shape_cast %0 : vector<1x8x256xf32> to vector<8x256xf32>
    %c0_2 = arith.constant 0 : index
    %c0_3 = arith.constant 0 : index
    %2 = vector.load %arg3[%c0_2, %c0_3] : memref<128x9xf32, #tpu.memory_space<vmem>>, vector<128x9xf32>
    %c0_4 = arith.constant 0 : index
    %c0_5 = arith.constant 0 : index
    %3 = vector.load %arg4[%c0_4, %c0_5] : memref<8x128xf32, #tpu.memory_space<vmem>>, vector<8x128xf32>
    %cst = arith.constant 1.000000e+00 : f32
    %4 = vector.broadcast %cst : f32 to vector<1x256xf32>
    %5 = tpu.concatenate %1, %4 in 0 : vector<8x256xf32>, vector<1x256xf32> -> vector<9x256xf32>
    %cst_6 = arith.constant dense<0.000000e+00> : vector<128x256xf32>
    %6 = tpu.matmul %2, %5, %cst_6 {dimension_numbers = #tpu.dot_dimension_numbers<[1], [0], [0], [1], [0, 0, 1, 1], [], []>} : vector<128x9xf32>, vector<9x256xf32>, vector<128x256xf32> -> vector<128x256xf32>
    %cst_7 = arith.constant dense<0x7F800000> : vector<256xf32>
    %7 = vector.multi_reduction <minimumf>, %6, %cst_7 [0] : vector<128x256xf32> to vector<256xf32>
    %8 = vector.shape_cast %7 : vector<256xf32> to vector<1x256xf32>
    %9 = tpu.iota {dimensions = array<i32: 0>} : vector<128x256xi32>
    %10 = vector.broadcast %8 : vector<1x256xf32> to vector<128x256xf32>
    %11 = arith.cmpf oeq, %6, %10 : vector<128x256xf32>
    %c128_i32 = arith.constant 128 : i32
    %12 = vector.broadcast %c128_i32 : i32 to vector<128x256xi32>
    %13 = arith.select %11, %9, %12 : vector<128x256xi1>, vector<128x256xi32>
    %cst_8 = arith.constant dense<2147483647> : vector<256xi32>
    %14 = vector.multi_reduction <minsi>, %13, %cst_8 [0] : vector<128x256xi32> to vector<256xi32>
    %15 = vector.shape_cast %14 : vector<256xi32> to vector<1x256xi32>
    %16 = vector.broadcast %15 : vector<1x256xi32> to vector<128x256xi32>
    %17 = arith.cmpi eq, %9, %16 : vector<128x256xi32>
    %18 = arith.extui %17 : vector<128x256xi1> to vector<128x256xi32>
    %19 = arith.sitofp %18 : vector<128x256xi32> to vector<128x256xf32>
    %cst_9 = arith.constant dense<0.000000e+00> : vector<8x256xf32>
    %20 = tpu.matmul %3, %19, %cst_9 {dimension_numbers = #tpu.dot_dimension_numbers<[1], [0], [0], [1], [0, 0, 1, 1], [], []>} : vector<8x128xf32>, vector<128x256xf32>, vector<8x256xf32> -> vector<8x256xf32>
    %c0_10 = arith.constant 0 : index
    %c0_11 = arith.constant 0 : index
    %c0_12 = arith.constant 0 : index
    %21 = vector.load %arg5[%c0_10, %c0_11, %c0_12] : memref<1x8x256xf32, #tpu.memory_space<vmem>>, vector<1x8x256xf32>
    %22 = vector.shape_cast %21 : vector<1x8x256xf32> to vector<8x256xf32>
    %23 = vector.shape_cast %20 : vector<8x256xf32> to vector<1x8x256xf32>
    tpu.vector_store %arg5[%c0_10, %c0_11, %c0_12], %23 {strides = array<i32>} : memref<1x8x256xf32, #tpu.memory_space<vmem>>, vector<1x8x256xf32>,
    %c0_13 = arith.constant 0 : index
    %c0_14 = arith.constant 0 : index
    %c0_15 = arith.constant 0 : index
    %24 = vector.load %arg6[%c0_13, %c0_14, %c0_15] : memref<1x1x256xi32, #tpu.memory_space<vmem>>, vector<1x1x256xi32>
    %25 = vector.shape_cast %24 : vector<1x1x256xi32> to vector<1x256xi32>
    %26 = vector.shape_cast %15 : vector<1x256xi32> to vector<1x1x256xi32>
    tpu.vector_store %arg6[%c0_13, %c0_14, %c0_15], %26 {strides = array<i32>} : memref<1x1x256xi32, #tpu.memory_space<vmem>>, vector<1x1x256xi32>,
    %cst_16 = arith.constant dense<0.000000e+00> : vector<128xf32>
    %27 = vector.multi_reduction <add>, %19, %cst_16 [1] : vector<128x256xf32> to vector<128xf32>
    %28 = vector.shape_cast %27 : vector<128xf32> to vector<128x1xf32>
    %c0_17 = arith.constant 0 : index
    %c0_18 = arith.constant 0 : index
    %c0_19 = arith.constant 0 : index
    %29 = vector.load %arg7[%c0_17, %c0_18, %c0_19] : memref<1x128x1xf32, #tpu.memory_space<vmem>>, vector<1x128x1xf32>
    %30 = vector.shape_cast %29 : vector<1x128x1xf32> to vector<128x1xf32>
    %31 = vector.shape_cast %28 : vector<128x1xf32> to vector<1x128x1xf32>
    tpu.vector_store %arg7[%c0_17, %c0_18, %c0_19], %31 {strides = array<i32>} : memref<1x128x1xf32, #tpu.memory_space<vmem>>, vector<1x128x1xf32>,
    %32 = arith.subf %20, %1 : vector<8x256xf32>
    %33 = arith.mulf %32, %32 : vector<8x256xf32>
    %cst_20 = arith.constant dense<0.000000e+00> : vector<256xf32>
    %34 = vector.multi_reduction <add>, %33, %cst_20 [0] : vector<8x256xf32> to vector<256xf32>
    %35 = vector.shape_cast %34 : vector<256xf32> to vector<1x256xf32>
    %cst_21 = arith.constant dense<0.000000e+00> : vector<1xf32>
    %36 = vector.multi_reduction <add>, %35, %cst_21 [1] : vector<1x256xf32> to vector<1xf32>
    %37 = vector.shape_cast %36 : vector<1xf32> to vector<1x1xf32>
    %c0_22 = arith.constant 0 : index
    %c0_23 = arith.constant 0 : index
    %c0_24 = arith.constant 0 : index
    %38 = vector.load %arg8[%c0_22, %c0_23, %c0_24] : memref<1x1x1xf32, #tpu.memory_space<vmem>>, vector<1x1x1xf32>
    %39 = vector.shape_cast %38 : vector<1x1x1xf32> to vector<1x1xf32>
    %40 = vector.shape_cast %37 : vector<1x1xf32> to vector<1x1x1xf32>
    tpu.vector_store %arg8[%c0_22, %c0_23, %c0_24], %40 {strides = array<i32>} : memref<1x1x1xf32, #tpu.memory_space<vmem>>, vector<1x1x1xf32>,
    return
  }
  func.func @transform_0(%arg0: i32, %arg1: i32) -> (i32, i32, i32) {
    %c0_i32 = arith.constant 0 : i32
    %c0_i32_0 = arith.constant 0 : i32
    return %arg0, %c0_i32, %arg1 : i32, i32, i32
  }
  func.func @transform_1(%arg0: i32, %arg1: i32) -> (i32, i32) {
    %c0_i32 = arith.constant 0 : i32
    %c0_i32_0 = arith.constant 0 : i32
    %c0_i32_1 = arith.constant 0 : i32
    return %c0_i32, %c0_i32_0 : i32, i32
  }
  func.func @transform_2(%arg0: i32, %arg1: i32) -> (i32, i32) {
    %c0_i32 = arith.constant 0 : i32
    %c0_i32_0 = arith.constant 0 : i32
    %c0_i32_1 = arith.constant 0 : i32
    return %c0_i32, %c0_i32_0 : i32, i32
  }
  func.func @transform_3(%arg0: i32, %arg1: i32) -> (i32, i32, i32) {
    %c0_i32 = arith.constant 0 : i32
    %c0_i32_0 = arith.constant 0 : i32
    return %arg0, %c0_i32, %arg1 : i32, i32, i32
  }
  func.func @transform_4(%arg0: i32, %arg1: i32) -> (i32, i32, i32) {
    %c1_i32 = arith.constant 1 : i32
    %0 = arith.muli %arg0, %c1_i32 : i32
    %1 = arith.addi %0, %arg1 : i32
    %c0_i32 = arith.constant 0 : i32
    %c0_i32_0 = arith.constant 0 : i32
    %c0_i32_1 = arith.constant 0 : i32
    return %1, %c0_i32, %c0_i32_0 : i32, i32, i32
  }
  func.func @transform_5(%arg0: i32, %arg1: i32) -> (i32, i32, i32) {
    %c1_i32 = arith.constant 1 : i32
    %0 = arith.muli %arg0, %c1_i32 : i32
    %1 = arith.addi %0, %arg1 : i32
    %c0_i32 = arith.constant 0 : i32
    %c0_i32_0 = arith.constant 0 : i32
    %c0_i32_1 = arith.constant 0 : i32
    return %1, %c0_i32, %c0_i32_0 : i32, i32, i32
  }
  func.func @transform_6(%arg0: i32, %arg1: i32) -> (i32, i32, i32) {
    %c1_i32 = arith.constant 1 : i32
    %0 = arith.muli %arg0, %c1_i32 : i32
    %1 = arith.addi %0, %arg1 : i32
    %c0_i32 = arith.constant 0 : i32
    %c0_i32_0 = arith.constant 0 : i32
    %c0_i32_1 = arith.constant 0 : i32
    return %1, %c0_i32, %c0_i32_0 : i32, i32, i32
  }
}

</mosaic_0001>

<bundles_post_ra>
// kernel: tpu_custom_call.1
= control target key start
LH: loop header
LB: loop body
LE: loop exit
PB: predicated region body
PF: predicated region fallthrough
CT: control target
= control target key end

     0   :  { %s2538_s0 = inlined_call_operand.vmem [shape: f32[2,8,256], index: 0, kind: input, shape index: {}]   ;;  %s2539_s1 = inlined_call_operand.vmem [shape: f32[128,9], index: 1, kind: input, shape index: {}]   ;;  %s2540_s2 = inlined_call_operand.vmem [shape: f32[8,128], index: 2, kind: input, shape index: {}]   ;;  %s2541_s3 = inlined_call_operand.hbm [shape: f32[2,8,256], index: 3, kind: output, shape index: {0}]   ;;  %s2542_s4 = inlined_call_operand.hbm [shape: s32[2,1,256], index: 4, kind: output, shape index: {1}]   ;;  %s2543_s5 = inlined_call_operand.vmem [shape: f32[2,128,1], index: 5, kind: output, shape index: {2}]   ;;  %s2544_s6 = inlined_call_operand.vmem [shape: f32[2,1,1], index: 6, kind: output, shape index: {3}]  }
   0x1   :  { %2553 = sst [smem:[#allocation8_spill]] %s2538_s0 }
   0x2   :  { %2554 = sst [smem:[#allocation9_spill]] %s2539_s1 }
   0x3   :  { %12 = vsyncpa [#allocation3], 0 }
   0x4   :  { %14 = vsyncpa [#allocation3 + $0x1], 0 }
   0x5   :  { %15 = vsyncpa [#allocation5], 0 }
   0x6   :  { %17 = vsyncpa [#allocation5 + $0x1], 0  ;;  %s1606_s21 = smov 0   ;;  %s1608_s22 = smov 0  }
   0x7   :  { %s1610_s23 = smov 0   ;;  %s1612_s24 = smov 0  }
   0x8   :  { %s1614_s25 = smov 0   ;;  %s1616_s26 = smov 0  }
   0x9 LB: > { %s1244_s27 = sadd.s32 4294967295, %s1562_s26   ;;  %s1245_s28 = sadd.s32 4294967294, %s1562_s26   ;;  %s1562_s26 = sphi %s1616_s26, %s23_s26   ;;  %s1558_s25 = sphi %s1614_s25, %s2579_s25   ;;  %s1554_s24 = sphi %s1612_s24, %s2578_s24   ;;  %s1550_s23 = sphi %s1610_s23, %s2577_s23   ;;  %s1546_s22 = sphi %s1608_s22, %s2576_s22   ;;  %s1542_s21 = sphi %s1606_s21, %s2575_s21  }
   0xa   : > { %s35_s29 = sadd.s32 1, %s1558_s25  ;;  %s114_s30 = sadd.s32 1, %s1550_s23 }
   0xb   : > { %p37_p0 = scmp.ge.s32.totalorder %s35_s29, 2  ;;  %p124_p1 = scmp.ne.s32.totalorder %s1550_s23, %s1546_s22 }
   0xc   : > { %p125_p2 = scmp.eq.s32.totalorder %s1244_s27, 1  ;;  %p130_p3 = scmp.ne.s32.totalorder %s1546_s22, %s1542_s21 }
   0xd   : > { %s2581_s29 = smov (%p37_p0, %s35_s29), 0  ;;  %p131_p5 = scmp.eq.s32.totalorder %s1245_s28, 1 }
   0xe   : > { %p1646_p4 = por %p125_p2, %p124_p1  ;;  %s109_s8 = ssub.s32 %s1558_s25, %s2581_s29 }
   0xf   : > { %p1248_p6 = scmp.ge.s32.totalorder %s1562_s26, 1  ;;  %p112_p7 = scmp.eq.s32.totalorder %s109_s8, 0 }
  0x10   : > { %p1653_p8 = por %p131_p5, %p130_p3  ;;  %p252_p9 = scmp.lt.s32.totalorder %s1562_s26, 3 }
  0x11   : > { %s1659_s10 = scalar_select %p112_p7, %s1550_s23, %s114_s30  }
  0x12   : > { %p253_p10 = pnand %p1248_p6, %p252_p9 }
  0x13   : > { %p302_p11 = scmp.lt.s32.totalorder (!%p253_p10), %s1554_s24, 1  ;;  %v1564_v0 = vmov (!%p253_p10), 0.0   ;;  %vm393_vm0 = vcmask (!%p253_p10), 1040384   ;;  %s2557_s0 = sld [smem:[#allocation8_spill]] (!%p253_p10)  ;;  %vm1565_vm1 = vmmov (!%p253_p10), 1   ;;  %v1566_v3 = vmov (!%p253_p10), 1.0  }
  0x14   : > { %256 = sbr.rel (%p253_p10) target bundleno = 783 (0x30f), region = 32  ;;  %461 = vmatprep.mubr.f32.mxu0 (!%p253_p10), %v1564_v0  ;;  %919 = vmatprep.mubr.f32.mxu1 (!%p253_p10), %v1564_v0  ;;  %vm1350_vm2 = vmpackc.low (!%p253_p10), %vm393_vm0, %vm1565_vm1  ;;  %s2558_s1 = sld [smem:[#allocation9_spill]] (!%p253_p10)  ;;  %vm344_vm3 = vcmask (!%p253_p10), 72704  }
  0x15   : > { %s2311_s28 = sand.u32 (!%p253_p10), 1, %s1546_s22   ;;  %s1347_s20 = sshll.u32 (!%p253_p10), %s1554_s24, 8 }
  0x16   : > { %s1250_s30 = sshll.u32 (!%p253_p10), %s2311_s28, 1  ;;  %s1249_s18 = sshll.u32 (!%p253_p10), %s2311_s28, 4 }
  0x17   : > { %s2373_s8 = scalar_lea.vmem (!%p253_p10), [#allocation4], %s1250_s30  ;;  %s279_s19 = scalar_lea.vmem (!%p253_p10), [#allocation2], %s1249_s18 }
  0x18   : > { %s1066_s13 = sshll.u32 (!%p253_p10), %s279_s19, 4  ;;  %s1569_s16 = smov (!%p253_p10), [#allocation2]   ;;  %s1067_s13 = int_to_ptr.vmem [resolvable:$true] %s1066_s13 }
  0x1a   : > { %v327_v6 = vld [vmem:[%s2558_s1] sm:$0xff] (!%p253_p10)  ;;  %v328_v7 = vld [vmem:[%s2558_s1 + $0x8] sm:$0xff] (!%p253_p10)  ;;  %v329_v8 = vld [vmem:[%s2558_s1 + $0x10] sm:$0xff] (!%p253_p10) }
  0x1b   : > { %s1665_s11 = scalar_select %p302_p11, %s1554_s24, 1  ;;  %v330_v9 = vld [vmem:[%s2558_s1 + $0x18] sm:$0xff]  ;;  %v331_v10 = vld [vmem:[%s2558_s1 + $0x20] sm:$0xff]  ;;  %v332_v11 = vld [vmem:[%s2558_s1 + $0x28] sm:$0xff] }
  0x1c   : > { %v333_v12 = vld [vmem:[%s2558_s1 + $0x30] sm:$0xff]  ;;  %v334_v13 = vld [vmem:[%s2558_s1 + $0x38] sm:$0xff]  ;;  %v335_v14 = vld [vmem:[%s2558_s1 + $0x40] sm:$0xff] }
  0x1d   : > { %s1345_s12 = sshll.u32 %s1665_s11, 4  ;;  %v336_v15 = vld [vmem:[%s2558_s1 + $0x48] sm:$0xff]  ;;  %v337_v16 = vld [vmem:[%s2558_s1 + $0x50] sm:$0xff]  ;;  %v338_v17 = vld [vmem:[%s2558_s1 + $0x58] sm:$0xff]  ;;  %s1346_s14 = sshll.u32 %s1665_s11, 7 }
  0x1e   : > { %s309_s15 = scalar_lea.vmem %s2557_s0, %s1345_s12  ;;  %v339_v18 = vld [vmem:[%s2558_s1 + $0x60] sm:$0xff]  ;;  %v340_v19 = vld [vmem:[%s2558_s1 + $0x68] sm:$0xff]  ;;  %v341_v20 = vld [vmem:[%s2558_s1 + $0x70] sm:$0xff]  ;;  %s2426_s17 = scalar_lea.vmem %s2543_s5, %s1346_s14 }
  0x1f   : > { %v1671_v1 = vld [vmem:[%s309_s15] sm:$0xff]  ;;  %v1673_v2 = vld [vmem:[%s309_s15 + $0x8] sm:$0xff]  ;;  %v342_v21 = vld [vmem:[%s2558_s1 + $0x78] sm:$0xff]  ;;  %s2467_s12 = scalar_lea.hbm %s2541_s3, %s1347_s20  ;;  %s1035_s14 = scalar_lea.sflag [#allocation3], %s2311_s28 }
  0x20   : > { %v1349_v4 = vpack.c.bf16 %v1566_v3, %v1673_v2  ;;  %v1352_v5 = vpack.c.bf16 %v1566_v3, %v1671_v1  ;;  %s1452_s15 = scalar_lea.vmem %s1067_s13, 256 }
  0x21   : > { %p1453_p12 = scmp.ne.s32.totalorder %s1067_s13, %s1452_s15 }
  0x22   : > { %1351 = vmatprep.subr.msk.bf16.mxu0 %vm1350_vm2, %v1349_v4 }
  0x23   : > { %1354 = vmatpush1.bf16.msk.msra.mxu0 %vm1350_vm2, %v1352_v5  ;;  %p1454_p13 = pnand %p1453_p12, %p1646_p4 }
  0x25   : > { %p1455_p0 = pneg %p1454_p13 }
  0x26   : > { %1257 = vmatmul.mubr.msk.f32.vlgmr.msra.gmra.mrb[0].mxu0 %vm344_vm3, %v327_v6 }
  0x27   : > { %467 = vmatprep.mubr.f32.mxu0 %v1564_v0 }
  0x2a   : > { %1258 = vmatmul.mubr.msk.f32.gmra.mrb[2].mxu0 %vm344_vm3, %v328_v7 }
  0x2b   : > { %473 = vmatprep.mubr.f32.mxu0 %v1564_v0 }
  0x2e   : > { %1259 = vmatmul.mubr.msk.f32.gmra.mrb[4].mxu0 %vm344_vm3, %v329_v8 }
  0x2f   : > { %479 = vmatprep.mubr.f32.mxu0 %v1564_v0 }
  0x32   : > { %1260 = vmatmul.mubr.msk.f32.gmra.mrb[6].mxu0 %vm344_vm3, %v330_v9 }
  0x33   : > { %485 = vmatprep.mubr.f32.mxu0 %v1564_v0 }
  0x36   : > { %1261 = vmatmul.mubr.msk.f32.gmra.mrb[8].mxu0 %vm344_vm3, %v331_v10 }
  0x37   : > { %491 = vmatprep.mubr.f32.mxu0 %v1564_v0 }
  0x3a   : > { %1262 = vmatmul.mubr.msk.f32.gmra.mrb[10].mxu0 %vm344_vm3, %v332_v11 }
  0x3b   : > { %497 = vmatprep.mubr.f32.mxu0 %v1564_v0 }
  0x3e   : > { %1263 = vmatmul.mubr.msk.f32.gmra.mrb[12].mxu0 %vm344_vm3, %v333_v12 }
  0x3f   : > { %503 = vmatprep.mubr.f32.mxu0 %v1564_v0 }
  0x42   : > { %1264 = vmatmul.mubr.msk.f32.gmra.mrb[14].mxu0 %vm344_vm3, %v334_v13 }
  0x43   : > { %509 = vmatprep.mubr.f32.mxu0 %v1564_v0 }
  0x46   : > { %1265 = vmatmul.mubr.msk.f32.gmra.mrb[16].mxu0 %vm344_vm3, %v335_v14 }
  0x47   : > { %515 = vmatprep.mubr.f32.mxu0 %v1564_v0 }
  0x4a   : > { %1266 = vmatmul.mubr.msk.f32.gmra.mrb[18].mxu0 %vm344_vm3, %v336_v15 }
  0x4b   : > { %521 = vmatprep.mubr.f32.mxu0 %v1564_v0 }
  0x4e   : > { %1267 = vmatmul.mubr.msk.f32.gmra.mrb[20].mxu0 %vm344_vm3, %v337_v16 }
  0x4f   : > { %527 = vmatprep.mubr.f32.mxu0 %v1564_v0 }
  0x52   : > { %1268 = vmatmul.mubr.msk.f32.gmra.mrb[22].mxu0 %vm344_vm3, %v338_v17 }
  0x53   : > { %533 = vmatprep.mubr.f32.mxu0 %v1564_v0 }
  0x56   : > { %1269 = vmatmul.mubr.msk.f32.gmra.mrb[24].mxu0 %vm344_vm3, %v339_v18 }
  0x57   : > { %539 = vmatprep.mubr.f32.mxu0 %v1564_v0 }
  0x5a   : > { %1270 = vmatmul.mubr.msk.f32.gmra.mrb[26].mxu0 %vm344_vm3, %v340_v19 }
  0x5b   : > { %545 = vmatprep.mubr.f32.mxu0 %v1564_v0 }
  0x5e   : > { %1271 = vmatmul.mubr.msk.f32.gmra.mrb[28].mxu0 %vm344_vm3, %v341_v20 }
  0x5f   : > { %551 = vmatprep.mubr.f32.mxu0 %v1564_v0 }
  0x62   : > { %1272 = vmatmul.mubr.msk.f32.gmra.mrb[30].mxu0 %vm344_vm3, %v342_v21 }
  0xf9   : > { %v1756_v22 = vpop.f32.mrb[0].mxu0 }
  0xfa   : > { %v1758_v23 = vpop.f32.mrb[1].mxu0 }
  0xfd   : > { %v1760_v24 = vpop.f32.mrb[2].mxu0 }
  0xfe   : > { %v1762_v25 = vpop.f32.mrb[3].mxu0 }
 0x101   : > { %v1764_v26 = vpop.f32.mrb[4].mxu0 }
 0x102   : > { %v558_v27 = vmin.f32 %v1756_v22, %v1764_v26  ;;  %v1768_v28 = vpop.f32.mrb[5].mxu0 }
 0x103   : > { %v579_v29 = vmin.f32 %v1758_v23, %v1768_v28 }
 0x105   : > { %v1772_v30 = vpop.f32.mrb[6].mxu0 }
 0x106   : > { %v559_v31 = vmin.f32 %v1760_v24, %v1772_v30  ;;  %v1776_v32 = vpop.f32.mrb[7].mxu0 }
 0x107   : > { %v580_v33 = vmin.f32 %v1762_v25, %v1776_v32 }
 0x109   : > { %v1780_v34 = vpop.f32.mrb[8].mxu0 }
 0x10a   : > { %v560_v35 = vmin.f32 %v558_v27, %v1780_v34  ;;  %v1783_v36 = vpop.f32.mrb[9].mxu0 }
 0x10b   : > { %v581_v37 = vmin.f32 %v579_v29, %v1783_v36 }
 0x10d   : > { %v1786_v38 = vpop.f32.mrb[10].mxu0 }
 0x10e   : > { %v561_v39 = vmin.f32 %v559_v31, %v1786_v38  ;;  %v1789_v40 = vpop.f32.mrb[11].mxu0  ;;  %v600_v31 = vlaneseq }
 0x10f   : > { %v582_v41 = vmin.f32 %v580_v33, %v1789_v40 }
 0x111   : > { %v1792_v42 = vpop.f32.mrb[12].mxu0 }
 0x112   : > { %v562_v43 = vmin.f32 %v560_v35, %v1792_v42  ;;  %v1795_v44 = vpop.f32.mrb[13].mxu0 }
 0x113   : > { %v583_v45 = vmin.f32 %v581_v37, %v1795_v44 }
 0x115   : > { %v1798_v46 = vpop.f32.mrb[14].mxu0 }
 0x116   : > { %v563_v47 = vmin.f32 %v561_v39, %v1798_v46  ;;  %v1801_v48 = vpop.f32.mrb[15].mxu0 }
 0x117   : > { %v584_v49 = vmin.f32 %v582_v41, %v1801_v48  ;;  %v1853_v41 = vshrl.u32 %v600_v31, 7 }
 0x119   : > { %v1804_v50 = vpop.f32.mrb[16].mxu0 }
 0x11a   : > { %v564_v51 = vmin.f32 %v562_v43, %v1804_v50  ;;  %v1807_v52 = vpop.f32.mrb[17].mxu0 }
 0x11b   : > { %v585_v53 = vmin.f32 %v583_v45, %v1807_v52 }
 0x11d   : > { %v1810_v54 = vpop.f32.mrb[18].mxu0 }
 0x11e   : > { %v565_v55 = vmin.f32 %v563_v47, %v1810_v54  ;;  %v1813_v56 = vpop.f32.mrb[19].mxu0 }
 0x11f   : > { %v586_v57 = vmin.f32 %v584_v49, %v1813_v56 }
 0x121   : > { %v1816_v58 = vpop.f32.mrb[20].mxu0 }
 0x122   : > { %v566_v59 = vmin.f32 %v564_v51, %v1816_v58  ;;  %v1819_v60 = vpop.f32.mrb[21].mxu0  ;;  %v1856_v51 = vadd.s32 8, %v1853_v41 }
 0x123   : > { %v587_v61 = vmin.f32 %v585_v53, %v1819_v60  ;;  %v1859_v53 = vadd.s32 16, %v1853_v41 }
 0x125   : > { %v1822_v62 = vpop.f32.mrb[22].mxu0 }
 0x126   : > { %v567_v63 = vmin.f32 %v565_v55, %v1822_v62  ;;  %v1825_v3 = vpop.f32.mrb[23].mxu0  ;;  %v1862_v55 = vadd.s32 24, %v1853_v41 }
 0x127   : > { %v588_v4 = vmin.f32 %v586_v57, %v1825_v3  ;;  %v1865_v57 = vadd.s32 32, %v1853_v41 }
 0x129   : > { %v1828_v5 = vpop.f32.mrb[24].mxu0 }
 0x12a   : > { %v568_v6 = vmin.f32 %v566_v59, %v1828_v5  ;;  %v1831_v7 = vpop.f32.mrb[25].mxu0  ;;  %v1868_v59 = vadd.s32 40, %v1853_v41 }
 0x12b   : > { %v589_v8 = vmin.f32 %v587_v61, %v1831_v7  ;;  %v1871_v61 = vadd.s32 48, %v1853_v41 }
 0x12d   : > { %v1834_v9 = vpop.f32.mrb[26].mxu0 }
 0x12e   : > { %v569_v10 = vmin.f32 %v567_v63, %v1834_v9  ;;  %v1837_v11 = vpop.f32.mrb[27].mxu0 }
 0x12f   : > { %v590_v12 = vmin.f32 %v588_v4, %v1837_v11  ;;  %v1876_v4 = vadd.s32 56, %v1853_v41 }
 0x131   : > { %v1840_v13 = vpop.f32.mrb[28].mxu0 }
 0x132   : > { %v570_v14 = vmin.f32 %v568_v6, %v1840_v13  ;;  %v1843_v15 = vpop.f32.mrb[29].mxu0  ;;  %v1879_v6 = vadd.s32 64, %v1853_v41 }
 0x133   : > { %v591_v16 = vmin.f32 %v589_v8, %v1843_v15  ;;  %v1882_v8 = vadd.s32 72, %v1853_v41 }
 0x135   : > { %v1846_v17 = vpop.f32.mrb[30].mxu0 }
 0x136   : > { %v571_v18 = vmin.f32 %v569_v10, %v1846_v17  ;;  %v1849_v19 = vpop.f32.mrb[31].mxu0  ;;  %v1885_v10 = vadd.s32 80, %v1853_v41 }
 0x137   : > { %v592_v20 = vmin.f32 %v590_v12, %v1849_v19  ;;  %v1888_v12 = vadd.s32 88, %v1853_v41 }
 0x138   : > { %v572_v21 = vmin.f32 %v570_v14, %v571_v18  ;;  %v1891_v14 = vadd.s32 96, %v1853_v41  ;;  %v1926_v18 = vadd.s32 104, %v1853_v41 }
 0x139   : > { %v593_v27 = vmin.f32 %v591_v16, %v592_v20  ;;  %v1929_v20 = vadd.s32 112, %v1853_v41 }
 0x13a   : > { %v573_v29 = vrot.slane %v572_v21, 4 }
 0x13b   : > { %v594_v33 = vrot.slane %v593_v27, 4 }
 0x13c   : > { %v574_v35 = vmin.f32 %v572_v21, %v573_v29  ;;  %v1932_v21 = vadd.s32 120, %v1853_v41 }
 0x13d   : > { %v595_v37 = vmin.f32 %v593_v27, %v594_v33 }
 0x13e   : > { %v575_v39 = vrot.slane %v574_v35, 2 }
 0x13f   : > { %v596_v43 = vrot.slane %v595_v37, 2 }
 0x140   : > { %v576_v45 = vmin.f32 %v574_v35, %v575_v39 }
 0x141   : > { %v597_v47 = vmin.f32 %v595_v37, %v596_v43 }
 0x142   : > { %v577_v49 = vrot.slane %v576_v45, 1 }
 0x143   : > { %v598_v16 = vrot.slane %v597_v47, 1 }
 0x144   : > { %v1873_v63 = vmin.f32 %v576_v45, %v577_v49 }
 0x145   : > { %v1934_v27 = vmin.f32 %v597_v47, %v598_v16 }
 0x146   : > { %vm617_vm4 = vcmp.eq.f32.partialorder %v1756_v22, %v1873_v63  ;;  %vm619_vm5 = vcmp.eq.f32.partialorder %v1760_v24, %v1873_v63  ;;  %vm621_vm6 = vcmp.eq.f32.partialorder %v1764_v26, %v1873_v63  ;;  %vm623_vm7 = vcmp.eq.f32.partialorder %v1772_v30, %v1873_v63 }
 0x147   : > { %vm625_vm8 = vcmp.eq.f32.partialorder %v1780_v34, %v1873_v63  ;;  %vm627_vm9 = vcmp.eq.f32.partialorder %v1786_v38, %v1873_v63  ;;  %vm629_vm10 = vcmp.eq.f32.partialorder %v1792_v42, %v1873_v63  ;;  %vm631_vm11 = vcmp.eq.f32.partialorder %v1798_v46, %v1873_v63 }
 0x148   : > { %vm633_vm12 = vcmp.eq.f32.partialorder %v1804_v50, %v1873_v63  ;;  %vm635_vm13 = vcmp.eq.f32.partialorder %v1810_v54, %v1873_v63  ;;  %vm637_vm14 = vcmp.eq.f32.partialorder %v1816_v58, %v1873_v63  ;;  %vm639_vm15 = vcmp.eq.f32.partialorder %v1822_v62, %v1873_v63 }
 0x149   : > { %vm641_vm0 = vcmp.eq.f32.partialorder %v1828_v5, %v1873_v63  ;;  %vm643_vm1 = vcmp.eq.f32.partialorder %v1834_v9, %v1873_v63  ;;  %vm645_vm2 = vcmp.eq.f32.partialorder %v1840_v13, %v1873_v63  ;;  %vm647_vm3 = vcmp.eq.f32.partialorder %v1846_v17, %v1873_v63 }
 0x14a   : > { %v649_v29 = vsel %vm617_vm4, %v1853_v41, 128  ;;  %v651_v33 = vsel %vm619_vm5, %v1856_v51, 128  ;;  %v653_v35 = vsel %vm621_vm6, %v1859_v53, 128  ;;  %v655_v37 = vsel %vm623_vm7, %v1862_v55, 128 }
 0x14b   : > { %v657_v22 = vsel %vm625_vm8, %v1865_v57, 128  ;;  %v659_v24 = vsel %vm627_vm9, %v1868_v59, 128  ;;  %v661_v26 = vsel %vm629_vm10, %v1871_v61, 128  ;;  %v663_v30 = vsel %vm631_vm11, %v1876_v4, 128 }
 0x14c   : > { %v665_v34 = vsel %vm633_vm12, %v1879_v6, 128  ;;  %v667_v38 = vsel %vm635_vm13, %v1882_v8, 128  ;;  %v669_v42 = vsel %vm637_vm14, %v1885_v10, 128  ;;  %v671_v46 = vsel %vm639_vm15, %v1888_v12, 128 }
 0x14d   : > { %vm681_vm4 = vcmp.lt.s32.totalorder %v649_v29, %v653_v35  ;;  %vm683_vm5 = vcmp.lt.s32.totalorder %v651_v33, %v655_v37  ;;  %vm618_vm6 = vcmp.eq.f32.partialorder %v1758_v23, %v1934_v27  ;;  %vm620_vm7 = vcmp.eq.f32.partialorder %v1762_v25, %v1934_v27 }
 0x14e   : > { %v682_v50 = vsel %vm681_vm4, %v649_v29, %v653_v35  ;;  %v684_v54 = vsel %vm683_vm5, %v651_v33, %v655_v37  ;;  %vm634_vm9 = vcmp.eq.f32.partialorder %v1807_v52, %v1934_v27  ;;  %vm642_vm15 = vcmp.eq.f32.partialorder %v1831_v7, %v1934_v27 }
 0x14f   : > { %vm685_vm10 = vcmp.lt.s32.totalorder %v682_v50, %v657_v22  ;;  %vm687_vm11 = vcmp.lt.s32.totalorder %v684_v54, %v659_v24  ;;  %vm644_vm12 = vcmp.eq.f32.partialorder %v1837_v11, %v1934_v27  ;;  %v673_v49 = vsel %vm641_vm0, %v1891_v14, 128 }
 0x150   : > { %v686_v58 = vsel %vm685_vm10, %v682_v50, %v657_v22  ;;  %v688_v62 = vsel %vm687_vm11, %v684_v54, %v659_v24  ;;  %vm640_vm11 = vcmp.eq.f32.partialorder %v1825_v3, %v1934_v27  ;;  %v675_v16 = vsel %vm643_vm1, %v1926_v18, 128 }
 0x151   : > { %vm689_vm4 = vcmp.lt.s32.totalorder %v686_v58, %v661_v26  ;;  %vm691_vm5 = vcmp.lt.s32.totalorder %v688_v62, %v663_v30  ;;  %v677_v35 = vsel %vm645_vm2, %v1929_v20, 128  ;;  %v679_v37 = vsel %vm647_vm3, %v1932_v21, 128 }
 0x152   : > { %v690_v39 = vsel %vm689_vm4, %v686_v58, %v661_v26  ;;  %v692_v43 = vsel %vm691_vm5, %v688_v62, %v663_v30  ;;  %vm646_vm4 = vcmp.eq.f32.partialorder %v1843_v15, %v1934_v27  ;;  %vm648_vm5 = vcmp.eq.f32.partialorder %v1849_v19, %v1934_v27 }
 0x153   : > { %vm693_vm14 = vcmp.lt.s32.totalorder %v690_v39, %v665_v34  ;;  %vm695_vm13 = vcmp.lt.s32.totalorder %v692_v43, %v667_v38  ;;  %v650_v9 = vsel %vm618_vm6, %v1853_v41, 128  ;;  %v652_v13 = vsel %vm620_vm7, %v1856_v51, 128 }
 0x154   : > { %v694_v45 = vsel %vm693_vm14, %v690_v39, %v665_v34  ;;  %v696_v47 = vsel %vm695_vm13, %v692_v43, %v667_v38  ;;  %vm2559_vm2 = vcmp.eq.f32.partialorder %v1768_v28, %v1934_v27  ;;  %vm2560_vm3 = vcmp.eq.f32.partialorder %v1776_v32, %v1934_v27 }
 0x155   : > { %vm697_vm10 = vcmp.lt.s32.totalorder %v694_v45, %v669_v42  ;;  %vm699_vm8 = vcmp.lt.s32.totalorder %v696_v47, %v671_v46  ;;  %v654_v17 = vsel %vm2559_vm2, %v1859_v53, 128  ;;  %v656_v63 = vsel %vm2560_vm3, %v1862_v55, 128 }
 0x156   : > { %v698_v29 = vsel %vm697_vm10, %v694_v45, %v669_v42  ;;  %v700_v33 = vsel %vm699_vm8, %v696_v47, %v671_v46  ;;  %vm2561_vm7 = vcmp.eq.f32.partialorder %v1783_v36, %v1934_v27  ;;  %vm720_vm8 = vcmp.lt.s32.totalorder %v650_v9, %v654_v17 }
 0x157   : > { %vm701_vm13 = vcmp.lt.s32.totalorder %v698_v29, %v673_v49  ;;  %vm703_vm14 = vcmp.lt.s32.totalorder %v700_v33, %v675_v16  ;;  %v658_v25 = vsel %vm2561_vm7, %v1865_v57, 128  ;;  %vm722_vm10 = vcmp.lt.s32.totalorder %v652_v13, %v656_v63 }
 0x158   : > { %v702_v5 = vsel %vm701_vm13, %v698_v29, %v673_v49  ;;  %v704_v22 = vsel %vm703_vm14, %v700_v33, %v675_v16  ;;  %vm2562_vm13 = vcmp.eq.f32.partialorder %v1789_v40, %v1934_v27  ;;  %v721_v34 = vsel %vm720_vm8, %v650_v9, %v654_v17 }
 0x159   : > { %vm705_vm0 = vcmp.lt.s32.totalorder %v702_v5, %v677_v35  ;;  %vm707_vm1 = vcmp.lt.s32.totalorder %v704_v22, %v679_v37  ;;  %v660_v28 = vsel %vm2562_vm13, %v1868_v59, 128  ;;  %v723_v32 = vsel %vm722_vm10, %v652_v13, %v656_v63 }
 0x15a   : > { %v706_v24 = vsel %vm705_vm0, %v702_v5, %v677_v35  ;;  %v708_v23 = vsel %vm707_vm1, %v704_v22, %v679_v37  ;;  %vm2563_vm14 = vcmp.eq.f32.partialorder %v1795_v44, %v1934_v27  ;;  %vm724_vm0 = vcmp.lt.s32.totalorder %v721_v34, %v658_v25 }
 0x15b   : > { %vm709_vm6 = vcmp.lt.s32.totalorder %v706_v24, %v708_v23  ;;  %v662_v38 = vsel %vm2563_vm14, %v1871_v61, 128  ;;  %vm726_vm1 = vcmp.lt.s32.totalorder %v723_v32, %v660_v28  ;;  %vm2564_vm3 = vcmp.eq.f32.partialorder %v1801_v48, %v1934_v27 }
 0x15c   : > { %v710_v26 = vsel %vm709_vm6, %v706_v24, %v708_v23  ;;  %v664_v36 = vsel %vm2564_vm3, %v1876_v4, 128  ;;  %v725_v42 = vsel %vm724_vm0, %v721_v34, %v658_v25  ;;  %v727_v46 = vsel %vm726_vm1, %v723_v32, %v660_v28 }
 0x15d   : > { %v711_v30 = vrot.slane %v710_v26, 4  ;;  %v666_v40 = vsel %vm634_vm9, %v1879_v6, 128  ;;  %vm728_vm6 = vcmp.lt.s32.totalorder %v725_v42, %v662_v38  ;;  %vm730_vm7 = vcmp.lt.s32.totalorder %v727_v46, %v664_v36 }
 0x15e   : > { %vm2565_vm8 = vcmp.eq.f32.partialorder %v1813_v56, %v1934_v27  ;;  %v729_v58 = vsel %vm728_vm6, %v725_v42, %v662_v38  ;;  %v731_v62 = vsel %vm730_vm7, %v727_v46, %v664_v36  ;;  %vm2566_vm10 = vcmp.eq.f32.partialorder %v1819_v60, %v1934_v27 }
 0x15f   : > { %vm712_vm2 = vcmp.lt.s32.totalorder %v710_v26, %v711_v30  ;;  %v668_v54 = vsel %vm2565_vm8, %v1882_v8, 128  ;;  %v670_v48 = vsel %vm2566_vm10, %v1885_v10, 128  ;;  %vm732_vm13 = vcmp.lt.s32.totalorder %v729_v58, %v666_v40 }
 0x160   : > { %v713_v50 = vsel %vm712_vm2, %v710_v26, %v711_v30  ;;  %vm734_vm14 = vcmp.lt.s32.totalorder %v731_v62, %v668_v54  ;;  %v672_v52 = vsel %vm640_vm11, %v1888_v12, 128  ;;  %v733_v39 = vsel %vm732_vm13, %v729_v58, %v666_v40 }
 0x161   : > { %v714_v44 = vrot.slane %v713_v50, 2  ;;  %v735_v43 = vsel %vm734_vm14, %v731_v62, %v668_v54  ;;  %v674_v56 = vsel %vm642_vm15, %v1891_v14, 128  ;;  %vm736_vm9 = vcmp.lt.s32.totalorder %v733_v39, %v670_v48 }
 0x162   : > { %vm738_vm1 = vcmp.lt.s32.totalorder %v735_v43, %v672_v52  ;;  %v676_v47 = vsel %vm644_vm12, %v1926_v18, 128  ;;  %v737_v49 = vsel %vm736_vm9, %v733_v39, %v670_v48  ;;  %v678_v3 = vsel %vm646_vm4, %v1929_v20, 128 }
 0x163   : > { %vm715_vm0 = vcmp.lt.s32.totalorder %v713_v50, %v714_v44  ;;  %v739_v16 = vsel %vm738_vm1, %v735_v43, %v672_v52  ;;  %vm740_vm11 = vcmp.lt.s32.totalorder %v737_v49, %v674_v56  ;;  %v1567_v29 = vmov 1966171168  }
 0x164   : > { %v716_v45 = vsel %vm715_vm0, %v713_v50, %v714_v44  ;;  %vm742_vm2 = vcmp.lt.s32.totalorder %v739_v16, %v676_v47  ;;  %v930_v7 = vunpack.c.l.s4 %v1567_v29  ;;  %v680_v33 = vsel %vm648_vm5, %v1932_v21, 128 }
 0x165   : > { %v717_v60 = vrot.slane %v716_v45, 1  ;;  %v741_v35 = vsel %vm740_vm11, %v737_v49, %v674_v56  ;;  %v743_v11 = vsel %vm742_vm2, %v739_v16, %v676_v47  ;;  %v1568_v43 = vmov 1.0|1.0  }
 0x166   : > { %vm744_vm12 = vcmp.lt.s32.totalorder %v741_v35, %v678_v3  ;;  %vm746_vm3 = vcmp.lt.s32.totalorder %v743_v11, %v680_v33  ;;  %v931_v9 = vunpack.c.0.s8 %v930_v7 }
 0x167   : > { %vm718_vm15 = vcmp.lt.s32.totalorder %v716_v45, %v717_v60  ;;  %v745_v37 = vsel %vm744_vm12, %v741_v35, %v678_v3  ;;  %v747_v5 = vsel %vm746_vm3, %v743_v11, %v680_v33 }
 0x168   : > { %v2096_v22 = vsel %vm718_vm15, %v716_v45, %v717_v60  ;;  %vm748_vm6 = vcmp.lt.s32.totalorder %v745_v37, %v747_v5  ;;  %v2111_v27 = vsub.s32 %v931_v9, %v1853_v41 }
 0x169   : > { %v749_v15 = vsel %vm748_vm6, %v745_v37, %v747_v5  ;;  %vm759_vm4 = vcmp.eq.s32.totalorder %v1853_v41, %v2096_v22  ;;  %vm763_vm7 = vcmp.eq.s32.totalorder %v1859_v53, %v2096_v22  ;;  %vm765_vm5 = vcmp.eq.s32.totalorder %v1862_v55, %v2096_v22 }
 0x16a   : > { %v750_v13 = vrot.slane %v749_v15, 4  ;;  %vm761_vm10 = vcmp.eq.s32.totalorder %v1856_v51, %v2096_v22  ;;  %vm767_vm13 = vcmp.eq.s32.totalorder %v1865_v57, %v2096_v22  ;;  %vm2545_vm14 = vcmp.eq.s32.totalorder %v1868_v59, %v2096_v22 }
 0x16b   : > { %v1277_v63 = vsel %vm763_vm7, 1.0, %v1564_v0  ;;  %v1273_v24 = vsel %vm759_vm4, 1.0, %v1564_v0  ;;  %v1279_v23 = vsel %vm765_vm5, 1.0, %v1564_v0  ;;  %v1275_v26 = vsel %vm761_vm10, 1.0, %v1564_v0 }
 0x16c   : > { %vm751_vm8 = vcmp.lt.s32.totalorder %v749_v15, %v750_v13  ;;  %v1283_v25 = vsel %vm2545_vm14, 1.0, %v1564_v0  ;;  %v1281_v30 = vsel %vm767_vm13, 1.0, %v1564_v0  ;;  %vm771_vm0 = vcmp.eq.s32.totalorder %v1871_v61, %v2096_v22 }
 0x16d   : > { %v752_v19 = vsel %vm751_vm8, %v749_v15, %v750_v13  ;;  %vm773_vm1 = vcmp.eq.s32.totalorder %v1876_v4, %v2096_v22  ;;  %vm775_vm11 = vcmp.eq.s32.totalorder %v1879_v6, %v2096_v22  ;;  %vm2552_vm2 = vcmp.eq.s32.totalorder %v1882_v8, %v2096_v22 }
 0x16e   : > { %v753_v17 = vrot.slane %v752_v19, 2  ;;  %vm2551_vm15 = vcmp.eq.s32.totalorder %v1885_v10, %v2096_v22  ;;  %vm2548_vm12 = vcmp.eq.s32.totalorder %v1888_v12, %v2096_v22  ;;  %vm2546_vm3 = vcmp.eq.s32.totalorder %v1891_v14, %v2096_v22 }
 0x16f   : > { %vm2547_vm6 = vcmp.eq.s32.totalorder %v1926_v18, %v2096_v22  ;;  %vm2550_vm8 = vcmp.eq.s32.totalorder %v1929_v20, %v2096_v22  ;;  %vm2549_vm14 = vcmp.eq.s32.totalorder %v1932_v21, %v2096_v22  ;;  %v1287_v32 = vsel %vm773_vm1, 1.0, %v1564_v0 }
 0x170   : > { %vm754_vm9 = vcmp.lt.s32.totalorder %v752_v19, %v753_v17  ;;  %v1285_v38 = vsel %vm771_vm0, 1.0, %v1564_v0  ;;  %v1291_v36 = vsel %vm2552_vm2, 1.0, %v1564_v0  ;;  %v1289_v42 = vsel %vm775_vm11, 1.0, %v1564_v0 }
 0x171   : > { %v755_v28 = vsel %vm754_vm9, %v752_v19, %v753_v17  ;;  %v1295_v46 = vsel %vm2548_vm12, 1.0, %v1564_v0  ;;  %v1293_v50 = vsel %vm2551_vm15, 1.0, %v1564_v0  ;;  %v2185_v40 = vsel %vm2546_vm3, 1.0, %v1564_v0  ;;  %vm1357_vm15 = vmpackc.low %vm761_vm10, %vm759_vm4 }
 0x172   : > { %v756_v34 = vrot.slane %v755_v28, 1  ;;  %v2193_v54 = vsel %vm2547_vm6, 1.0, %v1564_v0  ;;  %v2199_v58 = vsel %vm2549_vm14, 1.0, %v1564_v0  ;;  %v2205_v62 = vsel %vm2550_vm8, 1.0, %v1564_v0 }
 0x174   : > { %vm757_vm9 = vcmp.lt.s32.totalorder %v755_v28, %v756_v34 }
 0x175   : > { %v2187_v44 = vsel %vm757_vm9, %v755_v28, %v756_v34 }
 0x176   : > { %vm760_vm9 = vcmp.eq.s32.totalorder %v1853_v41, %v2187_v44  ;;  %vm762_vm3 = vcmp.eq.s32.totalorder %v1856_v51, %v2187_v44  ;;  %vm764_vm6 = vcmp.eq.s32.totalorder %v1859_v53, %v2187_v44  ;;  %vm766_vm12 = vcmp.eq.s32.totalorder %v1862_v55, %v2187_v44 }
 0x177   : > { %vm1355_vm14 = vmpackc.low %vm762_vm3, %vm760_vm9  ;;  %v1278_v48 = vsel %vm764_vm6, 1.0, %v1564_v0  ;;  %v1274_v52 = vsel %vm760_vm9, 1.0, %v1564_v0  ;;  %v1280_v39 = vsel %vm766_vm12, 1.0, %v1564_v0  ;;  %vm768_vm8 = vcmp.eq.s32.totalorder %v1865_v57, %v2187_v44 }
 0x178   : > { %1356 = vmatprep.subr.msk.bf16.mxu1 %vm1355_vm14, %v1568_v43  ;;  %v954_v45 = vadd.f32 %v1278_v48, %v1277_v63  ;;  %v948_v56 = vadd.f32 %v1274_v52, %v1273_v24  ;;  %v957_v60 = vadd.f32 %v1280_v39, %v1279_v23  ;;  %vm770_vm9 = vcmp.eq.s32.totalorder %v1868_v59, %v2187_v44  ;;  %vm1359_vm2 = vmpackc.low %vm766_vm12, %vm764_vm6 }
 0x179   : > { %1358 = vmatpush1.bf16.msk.msra.mxu1 %vm1357_vm15, %v1568_v43  ;;  %v1276_v41 = vsel %vm762_vm3, 1.0, %v1564_v0  ;;  %v1284_v47 = vsel %vm770_vm9, 1.0, %v1564_v0  ;;  %vm772_vm4 = vcmp.eq.s32.totalorder %v1871_v61, %v2187_v44  ;;  %vm774_vm10 = vcmp.eq.s32.totalorder %v1876_v4, %v2187_v44  ;;  %vm1361_vm15 = vmpackc.low %vm765_vm5, %vm763_vm7 }
 0x17a   : > { %955 = vadd.xlane.f32.xlu1 %v954_v45  ;;  %1360 = vmatprep.subr.msk.bf16.mxu1 %vm1359_vm2, %v1568_v43  ;;  %v951_v49 = vadd.f32 %v1276_v41, %v1275_v26  ;;  %v963_v16 = vadd.f32 %v1284_v47, %v1283_v25  ;;  %v1282_v51 = vsel %vm768_vm8, 1.0, %v1564_v0  ;;  %v1288_v3 = vsel %vm774_vm10, 1.0, %v1564_v0  ;;  %vm1363_vm7 = vmpackc.low %vm770_vm9, %vm768_vm8 }
 0x17b   : > { %949 = vadd.xlane.f32.xlu0 %v948_v56  ;;  %v960_v29 = vadd.f32 %v1282_v51, %v1281_v30  ;;  %v969_v7 = vadd.f32 %v1288_v3, %v1287_v32  ;;  %vm776_vm14 = vcmp.eq.s32.totalorder %v1879_v6, %v2187_v44  ;;  %vm778_vm2 = vcmp.eq.s32.totalorder %v1882_v8, %v2187_v44 }
 0x17c   : > { %v1286_v33 = vsel %vm772_vm4, 1.0, %v1564_v0  ;;  %v1292_v35 = vsel %vm778_vm2, 1.0, %v1564_v0  ;;  %vm780_vm12 = vcmp.eq.s32.totalorder %v1885_v10, %v2187_v44  ;;  %vm782_vm3 = vcmp.eq.s32.totalorder %v1888_v12, %v2187_v44 }
 0x17d   : > { %1362 = vmatpush1.bf16.msk.msra.mxu1 %vm1361_vm15, %v1568_v43  ;;  %v966_v53 = vadd.f32 %v1286_v33, %v1285_v38  ;;  %v975_v55 = vadd.f32 %v1292_v35, %v1291_v36  ;;  %v1290_v11 = vsel %vm776_vm14, 1.0, %v1564_v0  ;;  %v1296_v37 = vsel %vm782_vm3, 1.0, %v1564_v0 }
 0x17e   : > { %958 = vadd.xlane.f32.xlu1 %v957_v60  ;;  %1364 = vmatprep.subr.msk.bf16.mxu1 %vm1363_vm7, %v1568_v43  ;;  %v972_v5 = vadd.f32 %v1290_v11, %v1289_v42  ;;  %v981_v15 = vadd.f32 %v1296_v37, %v1295_v46  ;;  %vm784_vm5 = vcmp.eq.s32.totalorder %v1891_v14, %v2187_v44  ;;  %v1294_v9 = vsel %vm780_vm12, 1.0, %v1564_v0 }
 0x17f   : > { %952 = vadd.xlane.f32.xlu0 %v951_v49  ;;  %vm786_vm6 = vcmp.eq.s32.totalorder %v1926_v18, %v2187_v44  ;;  %v978_v13 = vadd.f32 %v1294_v9, %v1293_v50  ;;  %vm788_vm8 = vcmp.eq.s32.totalorder %v1929_v20, %v2187_v44  ;;  %vm790_vm9 = vcmp.eq.s32.totalorder %v1932_v21, %v2187_v44 }
 0x180   : > { %vm2567_vm15 = vcmp.eq.s32.totalorder %v1868_v59, %v2096_v22  ;;  %v1300_v19 = vsel %vm786_vm6, 1.0, %v1564_v0  ;;  %v1298_v17 = vsel %vm784_vm5, 1.0, %v1564_v0  ;;  %v1304_v57 = vsel %vm790_vm9, 1.0, %v1564_v0 }
 0x181   : > { %vm1365_vm7 = vmpackc.low %vm2567_vm15, %vm767_vm13  ;;  %v1302_v59 = vsel %vm788_vm8, 1.0, %v1564_v0  ;;  %v987_v63 = vadd.f32 %v1300_v19, %v2193_v54  ;;  %v984_v24 = vadd.f32 %v1298_v17, %v2185_v40  ;;  %v993_v23 = vadd.f32 %v1304_v57, %v2199_v58 }
 0x182   : > { %1366 = vmatpush1.bf16.msk.msra.mxu1 %vm1365_vm7, %v1568_v43  ;;  %vm1367_vm13 = vmpackc.low %vm774_vm10, %vm772_vm4  ;;  %v990_v26 = vadd.f32 %v1302_v59, %v2205_v62  ;;  %964 = vadd.xlane.f32.xlu1 %v963_v16  ;;  %v928_v0 = vcombine.low %v2096_v22, %v2187_v44  ;;  %vm945_vm15 = vcmp.lt.s32.totalorder %v600_v31, 256  ;;  %v343_v31 = vld [vmem:[%s2540_s2] sm:$0xff] }
 0x183   : > { %1368 = vmatprep.subr.msk.bf16.mxu1 %vm1367_vm13, %v1568_v43  ;;  %961 = vadd.xlane.f32.xlu0 %v960_v29  ;;  %vm1369_vm4 = vmpackc.low %vm773_vm1, %vm771_vm0  ;;  %vm2568_vm0 = vcmp.eq.s32.totalorder %v1882_v8, %v2096_v22  ;;  %vm2572_vm13 = vcmp.eq.s32.totalorder %v1926_v18, %v2096_v22 }
 0x184   : > { %v935_v25 = vrot.slane %v928_v0, %v2111_v27  ;;  %vm1371_vm10 = vmpackc.low %vm778_vm2, %vm776_vm14  ;;  %vm2570_vm2 = vcmp.eq.s32.totalorder %v1888_v12, %v2096_v22 }
 0x185   : > { %vm1373_vm1 = vmpackc.low %vm2568_vm0, %vm775_vm11  ;;  %vm2569_vm11 = vcmp.eq.s32.totalorder %v1885_v10, %v2096_v22 }
 0x186   : > { %1370 = vmatpush1.bf16.msk.msra.mxu1 %vm1369_vm4, %v1568_v43  ;;  %970 = vadd.xlane.f32.xlu1 %v969_v7  ;;  %v942_v61 = vrot.slane %v935_v25, %v2111_v27  ;;  %vm1375_vm14 = vmpackc.low %vm782_vm3, %vm780_vm12  ;;  %vm2571_vm3 = vcmp.eq.s32.totalorder %v1891_v14, %v2096_v22 }
 0x187   : > { %1372 = vmatprep.subr.msk.bf16.mxu1 %vm1371_vm10, %v1568_v43  ;;  %967 = vadd.xlane.f32.xlu0 %v966_v53  ;;  %vm1377_vm7 = vmpackc.low %vm2570_vm2, %vm2569_vm11  ;;  %vm2574_vm10 = vcmp.eq.s32.totalorder %v1932_v21, %v2096_v22 }
 0x188   : > { %947 = vst.msk [vmem:[%s2373_s8] sm:$0x3] %vm945_vm15, %v942_v61  ;;  %vm1379_vm12 = vmpackc.low %vm786_vm6, %vm784_vm5  ;;  %vm2573_vm6 = vcmp.eq.s32.totalorder %v1929_v20, %v2096_v22 }
 0x189   : > { %vm1381_vm4 = vmpackc.low %vm2572_vm13, %vm2571_vm3 }
 0x18a   : > { %1374 = vmatpush1.bf16.msk.msra.mxu1 %vm1373_vm1, %v1568_v43  ;;  %976 = vadd.xlane.f32.xlu1 %v975_v55  ;;  %vm1383_vm5 = vmpackc.low %vm790_vm9, %vm788_vm8  ;;  %vm996_vm8 = vcmask 7168  }
 0x18b   : > { %1376 = vmatprep.subr.msk.bf16.mxu1 %vm1375_vm14, %v1568_v43  ;;  %973 = vadd.xlane.f32.xlu0 %v972_v5  ;;  %vm1385_vm15 = vmpackc.low %vm2574_vm10, %vm2573_vm6 }
 0x18e   : > { %1378 = vmatpush1.bf16.msk.msra.mxu1 %vm1377_vm7, %v1568_v43  ;;  %982 = vadd.xlane.f32.xlu1 %v981_v15 }
 0x18f   : > { %1380 = vmatprep.subr.msk.bf16.mxu1 %vm1379_vm12, %v1568_v43  ;;  %979 = vadd.xlane.f32.xlu0 %v978_v13 }
 0x192   : > { %1382 = vmatpush1.bf16.msk.msra.mxu1 %vm1381_vm4, %v1568_v43  ;;  %988 = vadd.xlane.f32.xlu1 %v987_v63 }
 0x193   : > { %1384 = vmatprep.subr.msk.bf16.mxu1 %vm1383_vm5, %v1568_v43  ;;  %985 = vadd.xlane.f32.xlu0 %v984_v24 }
 0x196   : > { %1386 = vmatpush1.bf16.msk.msra.mxu1 %vm1385_vm15, %v1568_v43  ;;  %994 = vadd.xlane.f32.xlu1 %v993_v23 }
 0x197   : > { %991 = vadd.xlane.f32.xlu0 %v990_v26 }
 0x199   : > { %920 = vmatmul.mubr.f32.vlgmr.msra.gmra.mrb[0].mxu1 %v343_v31 }
 0x207   : > { %v956_v4 = vpop.xlane.xlu1 %955 }
 0x208   : > { %999 = vst.msk [vmem:[%s2426_s17 + $0x10] sm:$0xff] %vm996_vm8, %v956_v4  ;;  %v950_v6 = vpop.xlane.xlu0 %949 }
 0x209   : > { %997 = vst.msk [vmem:[%s2426_s17] sm:$0xff] %vm996_vm8, %v950_v6 }
 0x20b   : > { %v959_v8 = vpop.xlane.xlu1 %958 }
 0x20c   : > { %1000 = vst.msk [vmem:[%s2426_s17 + $0x18] sm:$0xff] %vm996_vm8, %v959_v8  ;;  %v953_v10 = vpop.xlane.xlu0 %952 }
 0x20d   : > { %998 = vst.msk [vmem:[%s2426_s17 + $0x8] sm:$0xff] %vm996_vm8, %v953_v10 }
 0x20f   : > { %v965_v12 = vpop.xlane.xlu1 %964 }
 0x210   : > { %1002 = vst.msk [vmem:[%s2426_s17 + $0x28] sm:$0xff] %vm996_vm8, %v965_v12  ;;  %v962_v14 = vpop.xlane.xlu0 %961 }
 0x211   : > { %1001 = vst.msk [vmem:[%s2426_s17 + $0x20] sm:$0xff] %vm996_vm8, %v962_v14 }
 0x213   : > { %v971_v18 = vpop.xlane.xlu1 %970 }
 0x214   : > { %1004 = vst.msk [vmem:[%s2426_s17 + $0x38] sm:$0xff] %vm996_vm8, %v971_v18  ;;  %v968_v20 = vpop.xlane.xlu0 %967 }
 0x215   : > { %1003 = vst.msk [vmem:[%s2426_s17 + $0x30] sm:$0xff] %vm996_vm8, %v968_v20 }
 0x217   : > { %v977_v21 = vpop.xlane.xlu1 %976 }
 0x218   : > { %1006 = vst.msk [vmem:[%s2426_s17 + $0x48] sm:$0xff] %vm996_vm8, %v977_v21  ;;  %v974_v22 = vpop.xlane.xlu0 %973 }
 0x219   : > { %1005 = vst.msk [vmem:[%s2426_s17 + $0x40] sm:$0xff] %vm996_vm8, %v974_v22 }
 0x21b   : > { %v983_v27 = vpop.xlane.xlu1 %982 }
 0x21c   : > { %1008 = vst.msk [vmem:[%s2426_s17 + $0x58] sm:$0xff] %vm996_vm8, %v983_v27  ;;  %v980_v30 = vpop.xlane.xlu0 %979 }
 0x21d   : > { %1007 = vst.msk [vmem:[%s2426_s17 + $0x50] sm:$0xff] %vm996_vm8, %v980_v30 }
 0x21f   : > { %v989_v28 = vpop.xlane.xlu1 %988 }
 0x220   : > { %1010 = vst.msk [vmem:[%s2426_s17 + $0x68] sm:$0xff] %vm996_vm8, %v989_v28  ;;  %v986_v34 = vpop.xlane.xlu0 %985 }
 0x221   : > { %1009 = vst.msk [vmem:[%s2426_s17 + $0x60] sm:$0xff] %vm996_vm8, %v986_v34 }
 0x223   : > { %v995_v32 = vpop.xlane.xlu1 %994 }
 0x224   : > { %1012 = vst.msk [vmem:[%s2426_s17 + $0x78] sm:$0xff] %vm996_vm8, %v995_v32  ;;  %v992_v38 = vpop.xlane.xlu0 %991 }
 0x225   : > { %1011 = vst.msk [vmem:[%s2426_s17 + $0x70] sm:$0xff] %vm996_vm8, %v992_v38  ;;  %s1456_s17 = sshll.u32 %s1569_s16, 4  ;;  %s1457_s17 = int_to_ptr.vmem [resolvable:$false] %s1456_s17 }
 0x226   : > { %s1458_s18 = scalar_lea.vmem %s1457_s17, 512  ;;  %p1459_p1 = scmp.lt.s32.totalorder %s1067_s13, %s1457_s17 }
 0x227   : > { %p1460_p2 = scmp.lt.s32.totalorder %s1458_s18, %s1452_s15 }
 0x229   : > { %p1461_p3 = por %p1460_p2, %p1459_p1 }
 0x22b   : > { %p1462_p5 = pnand %p1461_p3, %p1455_p0 }
 0x26c   : > { %v921_v36 = vpop.f32.mrb[0].mxu1 }
 0x26d   : > { %926 = vst [vmem:[%s279_s19] sm:$0xff] %v921_v36  ;;  %v1013_v42 = vsub.f32 %v921_v36, %v1671_v1  ;;  %v923_v46 = vpop.f32.mrb[1].mxu1 }
 0x26e   : > { %927 = vst [vmem:[%s279_s19 + $0x8] sm:$0xff] %v923_v46  ;;  %v1014_v50 = vsub.f32 %v923_v46, %v1673_v2 }
 0x26f   : > { %v1015_v40 = vmul.f32 %v1013_v42, %v1013_v42 }
 0x270   : > { %v1016_v44 = vmul.f32 %v1014_v50, %v1014_v50 }
 0x271   : > { %v1017_v54 = vrot.slane %v1015_v40, 4 }
 0x272   : > { %v1023_v58 = vrot.slane %v1016_v44, 4 }
 0x273   : > { %v1018_v62 = vadd.f32 %v1017_v54, %v1015_v40 }
 0x274   : > { %v1024_v48 = vadd.f32 %v1023_v58, %v1016_v44 }
 0x275   : > { %v1019_v52 = vrot.slane %v1018_v62, 2 }
 0x276   : > { %v1025_v39 = vrot.slane %v1024_v48, 2 }
 0x277   : > { %v1020_v43 = vadd.f32 %v1019_v52, %v1018_v62 }
 0x278   : > { %v1026_v45 = vadd.f32 %v1025_v39, %v1024_v48 }
 0x279   : > { %v1021_v56 = vrot.slane %v1020_v43, 1 }
 0x27a   : > { %v1027_v60 = vrot.slane %v1026_v45, 1 }
 0x27b   : > { %v1022_v1 = vadd.f32 %v1021_v56, %v1020_v43 }
 0x27c   : > { %v1028_v41 = vadd.f32 %v1027_v60, %v1026_v45 }
 0x27e   : > { %v1029_v47 = vadd.f32 %v1028_v41, %v1022_v1 }
 0x280   : > { %1030 = vadd.xlane.f32.xlu0 %v1029_v47 }
 0x281   : > { %1465 = shalt.err (!%p1462_p5)
}
 0x282   : > { %s1466_s19 = scalar_lea.hbm %s2467_s12, 256  ;;  %s1470_s30 = scalar_lea.hbm %s2541_s3, 512 }
 0x283   : > { %p1467_p6 = scmp.ne.s32.totalorder %s2467_s12, %s1466_s19  ;;  %p1471_p10 = scmp.lt.u32.totalorder %s2467_s12, %s2541_s3 }
 0x284   : > { %p1472_p11 = scmp.lt.u32.totalorder %s1470_s30, %s1466_s19  ;;  %p1474_p13 = scmp.lt.u32.totalorder %s1466_s19, %s2467_s12 }
 0x285   : > { %p1468_p7 = pnand %p1467_p6, %p1646_p4 }
 0x286   : > { %p1473_p12 = por %p1472_p11, %p1471_p10 }
 0x287   : > { %p1469_p9 = pneg %p1468_p7 }
 0x288   : > { %p1475_p0 = por %p1474_p13, %p1473_p12 }
 0x28a   : > { %p1476_p1 = pnand %p1475_p0, %p1469_p9 }
 0x28c   : > { %1479 = shalt.err (!%p1476_p1)
}
 0x28d   : > { %1387 = dma.vmem_to_hbm [thread:$0]  (%p1646_p4), %s1067_s13, 256, %s2467_s12, %s1035_s14  }
 0x28e   : > { %s1348_s15 = sshll.u32 %s1554_s24, 5  ;;  %s1081_s18 = sshll.u32 %s2373_s8, 4  ;;  %s1082_s18 = int_to_ptr.vmem [resolvable:$true] %s1081_s18 }
 0x28f   : > { %s2492_s16 = scalar_lea.hbm %s2542_s4, %s1348_s15  ;;  %s1040_s19 = scalar_lea.sflag [#allocation5], %s2311_s28 }
 0x290   : > { %s1480_s30 = scalar_lea.vmem %s1082_s18, 32  ;;  %s1570_s17 = smov [#allocation4]  }
 0x291   : > { %p1481_p2 = scmp.ne.s32.totalorder %s1082_s18, %s1480_s30  ;;  %s1484_s0 = sshll.u32 %s1570_s17, 4  ;;  %s1485_s0 = int_to_ptr.vmem [resolvable:$false] %s1484_s0 }
 0x292   : > { %s1486_s1 = scalar_lea.vmem %s1485_s0, 64  ;;  %p1487_p6 = scmp.lt.s32.totalorder %s1082_s18, %s1485_s0 }
 0x293   : > { %p1482_p3 = pnand %p1481_p2, %p1646_p4  ;;  %p1488_p7 = scmp.lt.s32.totalorder %s1486_s1, %s1480_s30 }
 0x295   : > { %p1483_p5 = pneg %p1482_p3  ;;  %p1489_p9 = por %p1488_p7, %p1487_p6 }
 0x297   : > { %p1490_p10 = pnand %p1489_p9, %p1483_p5 }
 0x299   : > { %1493 = shalt.err (!%p1490_p10)
}
 0x29a   : > { %s1494_s24 = scalar_lea.hbm %s2492_s16, 32  ;;  %s1498_s12 = scalar_lea.hbm %s2542_s4, 64 }
 0x29b   : > { %p1495_p11 = scmp.ne.s32.totalorder %s2492_s16, %s1494_s24  ;;  %p1499_p0 = scmp.lt.u32.totalorder %s2492_s16, %s2542_s4 }
 0x29c   : > { %p1500_p1 = scmp.lt.u32.totalorder %s1498_s12, %s1494_s24  ;;  %p1502_p3 = scmp.lt.u32.totalorder %s1494_s24, %s2492_s16 }
 0x29d   : > { %p1496_p12 = pnand %p1495_p11, %p1646_p4 }
 0x29e   : > { %p1501_p2 = por %p1500_p1, %p1499_p0 }
 0x29f   : > { %p1497_p13 = pneg %p1496_p12 }
 0x2a0   : > { %p1503_p5 = por %p1502_p3, %p1501_p2 }
 0x2a2   : > { %p1504_p6 = pnand %p1503_p5, %p1497_p13 }
 0x2a4   : > { %1507 = shalt.err (!%p1504_p6)
}
 0x2a5   : > { %1388 = dma.vmem_to_hbm [thread:$0]  (%p1646_p4), %s1082_s18, 32, %s2492_s16, %s1040_s19   ;;  %vm1032_vm9 = vcmask 0  }
 0x2a6   : > { %s323_s15 = scalar_lea.vmem %s2544_s6, %s1665_s11 }
 0x30d   : > { %v1031_v2 = vpop.xlane.xlu0 %1030 }
 0x30e   : > { %1033 = vst.msk [vmem:[%s323_s15] sm:$0x1] %vm1032_vm9, %v1031_v2 }
 0x30f PF: > { %p1398_p7 = scmp.ge.s32.totalorder %s1562_s26, 2  ;;  %s1101_s20 = sand.u32 1, %s1542_s21  }
 0x310   : > { %s1102_s27 = scalar_lea.sflag [#allocation3], %s1101_s20 }
 0x311   : > { %p1392_p9 = pnand %p1398_p7, %p1653_p8 }
 0x313   : > { %1533 = dma.done.wait (!%p1392_p9), %s1102_s27, 256  }
 0x314   : > { %1535 = vsyncadd (!%p1392_p9), %s1102_s27, 4294967040  ;;  %s1111_s7 = scalar_lea.sflag [#allocation5], %s1101_s20 }
 0x315   : > { %1537 = dma.done.wait (!%p1392_p9), %s1111_s7, 32  }
 0x316   : > { %1539 = vsyncadd (!%p1392_p9), %s1111_s7, 4294967264  ;;  %s23_s26 = sadd.s32 1, %s1562_s26   ;;  %s2575_s21 = smov %s1546_s22 }
 0x317   : > { %p20_p4 = scmp.ge.s32.totalorder %s23_s26, 4   ;;  %s2576_s22 = smov %s1550_s23 }
 0x318   : > { %s2577_s23 = smov %s1659_s10  ;;  %s2578_s24 = smov %s1558_s25 }
 0x319   : > { %s2579_s25 = smov %s2581_s29  ;;  %22 = sbr.rel (!%p20_p4) target bundleno = 9 (0x9), region = 108 }
 0x320   :  { %1132 = vsyncpa [#allocation3], 1 }
 0x321   :  { %1134 = vsyncpa [#allocation3 + $0x1], 1 }
 0x322   :  { %1135 = vsyncpa [#allocation5], 1 }
 0x323   :  { %1137 = vsyncpa [#allocation5 + $0x1], 1 }

</bundles_post_ra>
